<compile_context>
chip_gen: v7x
topology: tpu7x:2x2x1
jax: 0.10.0
libtpu: 0.0.40
codegen_flags: <defaults>
</compile_context>

<pallas_src>
import functools
import math

import jax
import jax.numpy as jnp
from jax.experimental import pallas as pl
from jax.experimental.pallas import tpu as pltpu


_MAX_DMA_CHUNKS = 8          # a few DMAs in flight; diminishing returns beyond this
_MIN_CHUNK_BYTES = 1 << 20   # don't split arrays smaller than ~1 MiB per chunk
_ROW_ALIGN = 32              # chunk boundaries stay tile-aligned for any dtype packing


def _leading_axis_chunks(n_rows, bytes_per_row):
    """Static (start, size) chunks along axis 0 with 32-row aligned boundaries."""
    total_bytes = n_rows * bytes_per_row
    n = int(min(_MAX_DMA_CHUNKS, max(1, total_bytes // _MIN_CHUNK_BYTES), n_rows))
    if n <= 1:
        return ((0, n_rows),)
    base = (n_rows // n // _ROW_ALIGN) * _ROW_ALIGN
    if base == 0:
        return ((0, n_rows),)
    chunks = [(i * base, base) for i in range(n - 1)]
    chunks.append(((n - 1) * base, n_rows - (n - 1) * base))
    return tuple(chunks)


def _hbm_copy_kernel(x_ref, o_ref, sems, *, chunks, rank):
    """Direct HBM->HBM copy: start all chunk DMAs, then wait on all of them."""
    copies = []
    for c, (start, size) in enumerate(chunks):
        idx = (pl.ds(start, size),) + (slice(None),) * (rank - 1)
        cp = pltpu.make_async_copy(x_ref.at[idx], o_ref.at[idx], sems.at[c])
        cp.start()
        copies.append(cp)
    for cp in copies:
        cp.wait()


def _dma_copy(arr):
    """One full HBM->HBM pass over `arr` via a grid-less Pallas DMA kernel."""
    if arr.ndim > 1:
        bytes_per_row = math.prod(arr.shape[1:]) * arr.dtype.itemsize
    else:
        bytes_per_row = arr.dtype.itemsize
    chunks = _leading_axis_chunks(arr.shape[0], bytes_per_row)
    total_bytes = arr.size * arr.dtype.itemsize
    return pl.pallas_call(
        functools.partial(_hbm_copy_kernel, chunks=chunks, rank=arr.ndim),
        out_shape=jax.ShapeDtypeStruct(arr.shape, arr.dtype),
        in_specs=[pl.BlockSpec(memory_space=pl.ANY)],
        out_specs=pl.BlockSpec(memory_space=pl.ANY),
        scratch_shapes=[pltpu.SemaphoreType.DMA((len(chunks),))],
        cost_estimate=pl.CostEstimate(
            flops=0, transcendentals=0, bytes_accessed=2 * total_bytes),
    )(arr)


@functools.partial(jax.jit, static_argnames=("target_shape",))
def batch_reshape(x, target_shape):
    """Pallas implementation of torch BatchReshape: x.view(-1, *target_shape)."""
    total = math.prod(x.shape)
    tail = math.prod(target_shape)
    assert total % tail == 0, "input size not divisible by prod(target_shape)"
    batch = total // tail

    if total % 128 == 0:
        # Lane-aligned total: run the copy on a (rows, 128) view (metadata
        # reshape only, no padding, no trailing slice).
        rows = total // 128
        out2d = _dma_copy(x.reshape(rows, 128))
        return out2d.reshape((batch,) + tuple(target_shape))

    # Non-lane-aligned total (rare): copy at the original shape, still zero
    # padding traffic; the reshape below is pure metadata glue.
    out = _dma_copy(x)
    return out.reshape((batch,) + tuple(target_shape))


if __name__ == "__main__":
    key = jax.random.PRNGKey(0)
    # Input layout: NCHW, matching PyTorch conv conventions.
    x = jax.random.normal(key, (2, 4, 16, 16), dtype=jnp.float32)

    # BatchReshape(shape=(4, 16, 16)) -> output (-1, 4, 16, 16) == (2, 4, 16, 16)
    target_shape = (4, 16, 16)

    out = batch_reshape(x, target_shape)
    out = jax.block_until_ready(out)

    # Reference: plain JAX reshape (identical semantics to torch .view on contiguous).
    ref = x.reshape((-1,) + target_shape)
    assert out.shape == ref.shape, (out.shape, ref.shape)
    assert out.dtype == ref.dtype
    assert bool(jnp.array_equal(out, ref))

    print("KERNEL_OK")
</pallas_src>

<mosaic_0001>
module attributes {stable_mosaic.version = 11 : i64} {
  func.func @_hbm_copy_kernel(%arg0: memref<16x128xf32, #tpu.memory_space<any>>, %arg1: memref<16x128xf32, #tpu.memory_space<any>>, %arg2: memref<1x!tpu.dma_semaphore, #tpu.memory_space<semaphore_mem>>) attributes {dimension_semantics = [], scalar_prefetch = 0 : i64, scratch_operands = 1 : i64, tpu.core_type = #tpu.core_type<tc>} {
    %c0_i32 = arith.constant 0 : i32
    %c0_i32_0 = arith.constant 0 : i32
    %c0_i32_1 = arith.constant 0 : i32
    %0 = tpu.memref_slice %arg0[%c0_i32_0, %c0_i32_1] : memref<16x128xf32, #tpu.memory_space<any>> -> memref<16x128xf32, #tpu.memory_space<any>>
    %c0_i32_2 = arith.constant 0 : i32
    %c0_i32_3 = arith.constant 0 : i32
    %1 = tpu.memref_slice %arg1[%c0_i32_2, %c0_i32_3] : memref<16x128xf32, #tpu.memory_space<any>> -> memref<16x128xf32, #tpu.memory_space<any>>
    %2 = tpu.memref_slice %arg2[%c0_i32] : memref<1x!tpu.dma_semaphore, #tpu.memory_space<semaphore_mem>> -> memref<1x!tpu.dma_semaphore, #tpu.memory_space<semaphore_mem>>
    %3 = tpu.memref_squeeze %2 : memref<1x!tpu.dma_semaphore, #tpu.memory_space<semaphore_mem>> -> memref<!tpu.dma_semaphore, #tpu.memory_space<semaphore_mem>>
    tpu.enqueue_dma source(%0 : memref<16x128xf32, #tpu.memory_space<any>>) target(%1 : memref<16x128xf32, #tpu.memory_space<any>>) target_semaphore(%3 : memref<!tpu.dma_semaphore, #tpu.memory_space<semaphore_mem>>)
    %c0_i32_4 = arith.constant 0 : i32
    %c0_i32_5 = arith.constant 0 : i32
    %c0_i32_6 = arith.constant 0 : i32
    %4 = tpu.memref_slice %arg0[%c0_i32_5, %c0_i32_6] : memref<16x128xf32, #tpu.memory_space<any>> -> memref<16x128xf32, #tpu.memory_space<any>>
    %c0_i32_7 = arith.constant 0 : i32
    %c0_i32_8 = arith.constant 0 : i32
    %5 = tpu.memref_slice %arg1[%c0_i32_7, %c0_i32_8] : memref<16x128xf32, #tpu.memory_space<any>> -> memref<16x128xf32, #tpu.memory_space<any>>
    %6 = tpu.memref_slice %arg2[%c0_i32_4] : memref<1x!tpu.dma_semaphore, #tpu.memory_space<semaphore_mem>> -> memref<1x!tpu.dma_semaphore, #tpu.memory_space<semaphore_mem>>
    %7 = tpu.memref_squeeze %6 : memref<1x!tpu.dma_semaphore, #tpu.memory_space<semaphore_mem>> -> memref<!tpu.dma_semaphore, #tpu.memory_space<semaphore_mem>>
    tpu.wait_dma2 semaphore(%7 : memref<!tpu.dma_semaphore, #tpu.memory_space<semaphore_mem>>) src(%4 : memref<16x128xf32, #tpu.memory_space<any>>) dst(%5 : memref<16x128xf32, #tpu.memory_space<any>>)
    return
  }
}

</mosaic_0001>

<bundles_post_ra>
// kernel: batch_reshape.1
= control target key start
LH: loop header
LB: loop body
LE: loop exit
PB: predicated region body
PF: predicated region fallthrough
CT: control target
= control target key end

     0   :  { %s92_s0 = inlined_call_operand.vmem [shape: f32[16,128], index: 0, kind: input, shape index: {}]   ;;  %s93_s1 = inlined_call_operand.vmem [shape: f32[16,128], index: 1, kind: output, shape index: {}]  }
   0x1   :  { %v38_v0 = vld [vmem:[%s92_s0] sm:$0xff]  ;;  %v40_v1 = vld [vmem:[%s92_s0 + $0x8] sm:$0xff] }
   0x2   :  { %39 = vst [vmem:[%s93_s1] sm:$0xff] %v38_v0  ;;  %41 = vst [vmem:[%s93_s1 + $0x8] sm:$0xff] %v40_v1 }
   0x3   :  { %49 = vsyncadd [#allocation2], 256 }
   0x4   :  { %68 = dma.done.wait [#allocation2], 256 }
   0x5   :  { %69 = vsyncadd [#allocation2], 4294967040 }
   0x6   :  { %53 = vsyncmov [#allocation2] }
   0x9   :  { %s54_s14 = vpop.sfrf %53 }
   0xa   :  { %p67_p0 = scmp.ne.s32.totalorder %s54_s14, 0 }
   0xc   :  { %58 = shalt.err (%p67_p0)  }

</bundles_post_ra>
